<compile_context>
chip_gen: v7x
topology: tpu7x:2x2x1
jax: 0.10.0
libtpu: 0.0.40
codegen_flags: <defaults>
</compile_context>

<pallas_src>
import math

import jax
import jax.numpy as jnp
from jax import lax
from jax.experimental import pallas as pl
from jax.experimental.pallas import tpu as pltpu


def _mcl_kernel(x_ref, w_ref, b_ref, o_ref):
    """One grid step: Cb independent linears via one batched MXU dot_general.

    x_ref: (Cb, Bb, in_dim)       channel-leading activations
    w_ref: (Cb, in_dim, out_dim)  pre-transposed weights
    b_ref: (Cb, 1, out_dim)       per-channel-block bias
    o_ref: (Cb, Bb, out_dim)
    """
    acc = lax.dot_general(
        x_ref[...], w_ref[...],
        dimension_numbers=(((2,), (1,)), ((0,), (0,))),
        preferred_element_type=jnp.float32,
    )  # (Cb, Bb, out_dim), f32 accumulation on the MXU
    # Single dense full-block store; bias broadcasts over the batch rows.
    o_ref[...] = (acc + b_ref[...].astype(jnp.float32)).astype(o_ref.dtype)


def _divisors(n):
    ds = set()
    i = 1
    while i * i <= n:
        if n % i == 0:
            ds.add(i)
            ds.add(n // i)
        i += 1
    return sorted(ds)


def _vmem_capacity_bytes():
    try:
        cap = getattr(pltpu.get_tpu_info(), "vmem_capacity_bytes", None)
        if cap:
            return int(cap)
    except Exception:
        pass
    return 64 * 1024 * 1024  # conservative: v7x per-TC VMEM


def _pick_channel_block(n_channel, per_channel_bytes, budget_bytes):
    for cb in sorted(_divisors(n_channel), reverse=True):
        if cb * per_channel_bytes <= budget_bytes:
            return cb
    return 1


def _pick_batch_block(batch, sublane_multiple, per_row_bytes, budget_bytes, max_rows):
    # Candidates: divisors of B that are sublane-aligned, plus the full extent
    # (always legal under the (8,128) BlockSpec rule).
    cands = {d for d in _divisors(batch) if d % sublane_multiple == 0}
    cands.add(batch)
    for bb in sorted(cands, reverse=True):
        if bb <= max_rows and bb * per_row_bytes <= budget_bytes:
            return bb
    return min(cands)


def multi_channel_linear(x, w, b, *, max_batch_rows=1024):
    """x: (B, C, in_dim); w: (C, out_dim, in_dim); b: (1, C, out_dim) -> (B, C, out_dim)."""
    B, C, in_dim = x.shape
    _, out_dim, _ = w.shape
    out_dtype = x.dtype

    # One-time layout prep (done by XLA outside the kernel):
    x_t = jnp.swapaxes(x, 0, 1)          # (C, B, in_dim)
    w_t = jnp.swapaxes(w, 1, 2)          # (C, in_dim, out_dim)
    b_t = jnp.swapaxes(b, 0, 1)          # (C, 1, out_dim)

    x_isz = jnp.dtype(x.dtype).itemsize
    w_isz = jnp.dtype(w.dtype).itemsize
    b_isz = jnp.dtype(b.dtype).itemsize
    o_isz = jnp.dtype(out_dtype).itemsize

    # --- VMEM-driven block sizing, per chip generation.
    vmem_cap = _vmem_capacity_bytes()
    vmem_limit = max(32 * 2**20, min(100 * 2**20, int(0.75 * vmem_cap)))
    block_budget = int(0.6 * vmem_limit)          # headroom for compiler scratch

    # Channel block: weight + bias tiles are double-buffered; cap at 1/3 of budget.
    per_chan_w = 2 * in_dim * out_dim * w_isz + 2 * out_dim * b_isz
    Cb = _pick_channel_block(C, per_chan_w, block_budget // 3)

    # Batch block: sublane-aligned for the dtype (8 f32 / 16 bf16 / 32 int8).
    sublane = 8 * max(1, 4 // x_isz)
    per_row = (2 * Cb * in_dim * x_isz            # x block, double-buffered
               + 2 * Cb * out_dim * o_isz         # out block, double-buffered
               + Cb * out_dim * 4)                # f32 accumulator headroom
    Bb = _pick_batch_block(B, sublane, per_row,
                           block_budget - Cb * per_chan_w, max_batch_rows)

    n_cblk = C // Cb
    n_bblk = B // Bb

    # Channel-outer keeps the weight tile resident while batch sweeps; if the
    # channel axis is degenerate, put batch outermost so the megacore split
    # (v7x, 2 TCs) always has a non-trivial parallel axis.
    if n_cblk > 1:
        grid = (n_cblk, n_bblk)
        x_map = lambda ci, bi: (ci, bi, 0)
        w_map = lambda ci, bi: (ci, 0, 0)
    else:
        grid = (n_bblk, n_cblk)
        x_map = lambda bi, ci: (ci, bi, 0)
        w_map = lambda bi, ci: (ci, 0, 0)
    b_map = w_map
    o_map = x_map

    cost = pl.CostEstimate(
        flops=2 * B * C * in_dim * out_dim,
        transcendentals=0,
        bytes_accessed=(x.size * x_isz + w.size * w_isz + b.size * b_isz
                        + B * C * out_dim * o_isz),
    )

    out_t = pl.pallas_call(
        _mcl_kernel,
        out_shape=jax.ShapeDtypeStruct((C, B, out_dim), out_dtype),
        grid_spec=pltpu.PrefetchScalarGridSpec(
            num_scalar_prefetch=0,
            grid=grid,
            in_specs=[
                pl.BlockSpec((Cb, Bb, in_dim), x_map),
                pl.BlockSpec((Cb, in_dim, out_dim), w_map),
                pl.BlockSpec((Cb, 1, out_dim), b_map),
            ],
            out_specs=pl.BlockSpec((Cb, Bb, out_dim), o_map),
        ),
        compiler_params=pltpu.CompilerParams(
            dimension_semantics=("parallel", "parallel"),
            vmem_limit_bytes=vmem_limit,
        ),
        cost_estimate=cost,
    )(x_t, w_t, b_t)

    return jnp.swapaxes(out_t, 0, 1)     # back to (B, C, out_dim)


def init_params(key, in_dim, out_dim, n_channel, dtype=jnp.float32):
    """Deterministic init matching the PyTorch module's shapes / distributions."""
    kw, kb = jax.random.split(key)
    # kaiming_uniform_(w, a=sqrt(3)): gain = sqrt(2/(1+a^2)) = sqrt(1/2)
    # PyTorch fan_in for a (n_channel, out_dim, in_dim) tensor is out_dim * in_dim.
    fan_in = out_dim * in_dim
    w_bound = math.sqrt(0.5) * math.sqrt(3.0 / fan_in)
    w = jax.random.uniform(kw, (n_channel, out_dim, in_dim),
                           minval=-w_bound, maxval=w_bound, dtype=dtype)
    b_bound = 1.0 / math.sqrt(fan_in)
    b = jax.random.uniform(kb, (1, n_channel, out_dim),
                           minval=-b_bound, maxval=b_bound, dtype=dtype)
    return w, b


if __name__ == "__main__":
    key = jax.random.PRNGKey(0)
    k_x, k_p = jax.random.split(key)

    batch, n_channel, in_dim, out_dim = 8, 4, 32, 16
    x = jax.random.normal(k_x, (batch, n_channel, in_dim), dtype=jnp.float32)
    w, b = init_params(k_p, in_dim, out_dim, n_channel)

    out = jax.block_until_ready(multi_channel_linear(x, w, b))

    # Pure-JAX reference of the PyTorch forward: (w * x.unsqueeze(-2)).sum(-1) + b
    ref = jnp.sum(w[None, :, :, :] * x[:, :, None, :], axis=-1) + b
    assert out.shape == (batch, n_channel, out_dim)
    assert jnp.allclose(out, ref, atol=1e-5, rtol=1e-5)

    print("KERNEL_OK")
</pallas_src>

<mosaic_0001>
module attributes {stable_mosaic.version = 11 : i64} {
  func.func @_mcl_kernel(%arg0: i32, %arg1: i32, %arg2: memref<4x8x32xf32, #tpu.memory_space<vmem>>, %arg3: memref<4x32x16xf32, #tpu.memory_space<vmem>>, %arg4: memref<4x1x16xf32, #tpu.memory_space<vmem>>, %arg5: memref<4x8x16xf32, #tpu.memory_space<vmem>>) attributes {dimension_semantics = [#tpu.dimension_semantics<parallel>, #tpu.dimension_semantics<parallel>], iteration_bounds = array<i64: 1, 1>, scalar_prefetch = 0 : i64, scratch_operands = 0 : i64, tpu.core_type = #tpu.core_type<tc>, window_params = [{transform_indices = @transform_0, window_bounds = array<i64: 4, 8, 32>}, {transform_indices = @transform_1, window_bounds = array<i64: 4, 32, 16>}, {transform_indices = @transform_2, window_bounds = array<i64: 4, 1, 16>}, {transform_indices = @transform_3, window_bounds = array<i64: 4, 8, 16>}]} {
    %c0 = arith.constant 0 : index
    %c0_0 = arith.constant 0 : index
    %c0_1 = arith.constant 0 : index
    %0 = vector.load %arg2[%c0, %c0_0, %c0_1] : memref<4x8x32xf32, #tpu.memory_space<vmem>>, vector<4x8x32xf32>
    %c0_2 = arith.constant 0 : index
    %c0_3 = arith.constant 0 : index
    %c0_4 = arith.constant 0 : index
    %1 = vector.load %arg3[%c0_2, %c0_3, %c0_4] : memref<4x32x16xf32, #tpu.memory_space<vmem>>, vector<4x32x16xf32>
    %cst = arith.constant dense<0.000000e+00> : vector<4x8x16xf32>
    %2 = tpu.matmul %0, %1, %cst {dimension_numbers = #tpu.dot_dimension_numbers<[2], [1], [1], [2], [0, 0, 0, 1, 1, 2], [0], [0]>} : vector<4x8x32xf32>, vector<4x32x16xf32>, vector<4x8x16xf32> -> vector<4x8x16xf32>
    %c0_5 = arith.constant 0 : index
    %c0_6 = arith.constant 0 : index
    %c0_7 = arith.constant 0 : index
    %3 = vector.load %arg4[%c0_5, %c0_6, %c0_7] : memref<4x1x16xf32, #tpu.memory_space<vmem>>, vector<4x1x16xf32>
    %4 = vector.broadcast %3 : vector<4x1x16xf32> to vector<4x8x16xf32>
    %5 = arith.addf %2, %4 : vector<4x8x16xf32>
    %c0_8 = arith.constant 0 : index
    %c0_9 = arith.constant 0 : index
    %c0_10 = arith.constant 0 : index
    %6 = vector.load %arg5[%c0_8, %c0_9, %c0_10] : memref<4x8x16xf32, #tpu.memory_space<vmem>>, vector<4x8x16xf32>
    tpu.vector_store %arg5[%c0_8, %c0_9, %c0_10], %5 {strides = array<i32>} : memref<4x8x16xf32, #tpu.memory_space<vmem>>, vector<4x8x16xf32>,
    return
  }
  func.func @transform_0(%arg0: i32, %arg1: i32) -> (i32, i32, i32) {
    %c0_i32 = arith.constant 0 : i32
    %c0_i32_0 = arith.constant 0 : i32
    return %arg1, %arg0, %c0_i32 : i32, i32, i32
  }
  func.func @transform_1(%arg0: i32, %arg1: i32) -> (i32, i32, i32) {
    %c0_i32 = arith.constant 0 : i32
    %c0_i32_0 = arith.constant 0 : i32
    %c0_i32_1 = arith.constant 0 : i32
    return %arg1, %c0_i32, %c0_i32_0 : i32, i32, i32
  }
  func.func @transform_2(%arg0: i32, %arg1: i32) -> (i32, i32, i32) {
    %c0_i32 = arith.constant 0 : i32
    %c0_i32_0 = arith.constant 0 : i32
    %c0_i32_1 = arith.constant 0 : i32
    return %arg1, %c0_i32, %c0_i32_0 : i32, i32, i32
  }
  func.func @transform_3(%arg0: i32, %arg1: i32) -> (i32, i32, i32) {
    %c0_i32 = arith.constant 0 : i32
    %c0_i32_0 = arith.constant 0 : i32
    return %arg1, %arg0, %c0_i32 : i32, i32, i32
  }
}

</mosaic_0001>

<bundles_post_ra>
// kernel: tpu_custom_call.1
= control target key start
LH: loop header
LB: loop body
LE: loop exit
PB: predicated region body
PF: predicated region fallthrough
CT: control target
= control target key end

     0   :  { %v503_v3 = vmov 0.0|0.0   ;;  %vm504_vm0 = vmmov 0   ;;  %v505_v11 = vmov 0.0   ;;  %vm63_vm1 = vcmask 261120   ;;  %s625_s0 = inlined_call_operand.vmem [shape: f32[4,8,32], index: 0, kind: input, shape index: {}]   ;;  %s626_s1 = inlined_call_operand.vmem [shape: f32[4,32,16], index: 1, kind: input, shape index: {}]   ;;  %s627_s2 = inlined_call_operand.vmem [shape: f32[4,1,16], index: 2, kind: input, shape index: {}]   ;;  %s628_s3 = inlined_call_operand.hbm [shape: f32[4,8,16], index: 3, kind: output, shape index: {}]  }
   0x1   :  { %v19_v0 = vld [vmem:[%s626_s1] sm:$0xff]  ;;  %v20_v1 = vld [vmem:[%s626_s1 + $0x8] sm:$0xff]  ;;  %449 = vmatprep.subr.bf16.mxu0 %v503_v3  ;;  %455 = vmatprep.subr.bf16.mxu1 %v503_v3  ;;  %v21_v6 = vld [vmem:[%s626_s1 + $0x10] sm:$0xff] }
   0x2   :  { %v23_v2 = vld [vmem:[%s626_s1 + $0x20] sm:$0xff]  ;;  %v450_v4 = vpack.c.bf16 %v20_v1, %v19_v0  ;;  %v24_v5 = vld [vmem:[%s626_s1 + $0x28] sm:$0xff]  ;;  %v22_v7 = vld [vmem:[%s626_s1 + $0x18] sm:$0xff]  ;;  %413 = vmatprep.mubr.msk.f32.mxu0 %vm504_vm0, %v505_v11  ;;  %424 = vmatprep.mubr.msk.f32.mxu1 %vm504_vm0, %v505_v11 }
   0x3   :  { %v456_v8 = vpack.c.bf16 %v24_v5, %v23_v2  ;;  %v25_v9 = vld [vmem:[%s626_s1 + $0x30] sm:$0xff]  ;;  %v26_v10 = vld [vmem:[%s626_s1 + $0x38] sm:$0xff]  ;;  %v453_v12 = vpack.c.bf16 %v22_v7, %v21_v6  ;;  %v27_v14 = vld [vmem:[%s626_s1 + $0x40] sm:$0xff] }
   0x4   :  { %451 = vmatpush3.bf16.msra.mxu0 %v450_v4  ;;  %v459_v13 = vpack.c.bf16 %v26_v10, %v25_v9  ;;  %v28_v15 = vld [vmem:[%s626_s1 + $0x48] sm:$0xff]  ;;  %v31_v16 = vld [vmem:[%s626_s1 + $0x60] sm:$0xff] }
   0x5   :  { %457 = vmatpush3.bf16.msra.mxu1 %v456_v8  ;;  %452 = vmatprep.subr.bf16.mxu0 %v503_v3  ;;  %v32_v17 = vld [vmem:[%s626_s1 + $0x68] sm:$0xff]  ;;  %v15_v18 = vld [vmem:[%s625_s0] sm:$0xff]  ;;  %v462_v19 = vpack.c.bf16 %v28_v15, %v27_v14 }
   0x6   :  { %458 = vmatprep.subr.bf16.mxu1 %v503_v3 }
   0x8   :  { %454 = vmatpush3.bf16.msra.mxu0 %v453_v12 }
   0x9   :  { %8 = vsyncpa [#allocation3], 0  ;;  %460 = vmatpush3.bf16.msra.mxu1 %v459_v13  ;;  %v16_v20 = vld [vmem:[%s625_s0 + $0x8] sm:$0xff]  ;;  %461 = vmatprep.subr.bf16.mxu0 %v503_v3  ;;  %v468_v21 = vpack.c.bf16 %v32_v17, %v31_v16  ;;  %v29_v22 = vld [vmem:[%s626_s1 + $0x50] sm:$0xff]  ;;  %vm356_vm2 = vcmask 130048   ;;  %s506_s29 = smov [#allocation2]  }
   0xa   :  { %v30_v23 = vld [vmem:[%s626_s1 + $0x58] sm:$0xff]  ;;  %467 = vmatprep.subr.bf16.mxu1 %v503_v3  ;;  %v33_v24 = vld [vmem:[%s626_s1 + $0x70] sm:$0xff]  ;;  %v377_v30 = vld [vmem:[%s627_s2] ss:$0 sm:$0xff]  ;;  %s366_s30 = sshll.u32 %s506_s29, 4  ;;  %s367_s30 = int_to_ptr.vmem [resolvable:$true] %s366_s30 }
   0xb   :  { %v34_v25 = vld [vmem:[%s626_s1 + $0x78] sm:$0xff]  ;;  %414 = vmatmul.mubr.msk.f32.vlgmr.msra.gmra.mrb[0].mxu0 %vm63_vm1, %v15_v18  ;;  %v465_v26 = vpack.c.bf16 %v30_v23, %v29_v22  ;;  %v17_v28 = vld [vmem:[%s625_s0 + $0x10] sm:$0xff]  ;;  %v378_v31 = vld [vmem:[%s627_s2 + $0x1] ss:$0 sm:$0xff]  ;;  %s479_s6 = scalar_lea.vmem %s367_s30, 512  ;;  %p484_p1 = scmp.lt.s32.totalorder %s367_s30, %s367_s30 }
   0xc   :  { %425 = vmatmul.mubr.msk.f32.vlgmr.msra.gmra.mrb[0].mxu1 %vm63_vm1, %v16_v20  ;;  %463 = vmatpush3.bf16.msra.mxu0 %v462_v19  ;;  %v471_v27 = vpack.c.bf16 %v34_v25, %v33_v24  ;;  %v18_v29 = vld [vmem:[%s625_s0 + $0x18] sm:$0xff]  ;;  %v379_v38 = vld [vmem:[%s627_s2 + $0x2] ss:$0 sm:$0xff]  ;;  %v380_v39 = vld [vmem:[%s627_s2 + $0x3] ss:$0 sm:$0xff]  ;;  %p480_p0 = scmp.ne.s32.totalorder %s367_s30, %s479_s6  ;;  %p485_p2 = scmp.lt.s32.totalorder %s479_s6, %s479_s6 }
   0xd   :  { %469 = vmatpush3.bf16.msra.mxu1 %v468_v21  ;;  %464 = vmatprep.subr.bf16.mxu0 %v503_v3 }
   0xe   :  { %470 = vmatprep.subr.bf16.mxu1 %v503_v3  ;;  %435 = vmatprep.mubr.msk.f32.mxu0 %vm504_vm0, %v505_v11  ;;  %p486_p3 = por %p485_p2, %p484_p1 }
   0xf   :  { %446 = vmatprep.mubr.msk.f32.mxu1 %vm504_vm0, %v505_v11 }
  0x10   :  { %466 = vmatpush3.bf16.msra.mxu0 %v465_v26  ;;  %p487_p4 = pnand %p486_p3, %p480_p0 }
  0x11   :  { %472 = vmatpush3.bf16.msra.mxu1 %v471_v27 }
  0x13   :  { %436 = vmatmul.mubr.msk.f32.vlgmr.msra.gmra.mrb[2].mxu0 %vm63_vm1, %v17_v28 }
  0x14   :  { %447 = vmatmul.mubr.msk.f32.vlgmr.msra.gmra.mrb[2].mxu1 %vm63_vm1, %v18_v29 }
  0xde   :  { %v133_v32 = vpop.f32.mrb[0].mxu0 }
  0xdf   :  { %v134_v33 = vadd.f32 %v377_v30, %v133_v32  ;;  %v206_v34 = vpop.f32.mrb[0].mxu1  ;;  %v415_v35 = vpop.f32.mrb[1].mxu0 }
  0xe0   :  { %v207_v36 = vadd.f32 %v378_v31, %v206_v34  ;;  %v426_v37 = vpop.f32.mrb[1].mxu1 }
  0xe1   :  { %357 = vst.msk [vmem:[#allocation2] sm:$0xff] %vm356_vm2, %v134_v33 }
  0xe2   :  { %358 = vst.msk [vmem:[#allocation2 + $0x8] sm:$0xff] %vm356_vm2, %v207_v36 }
  0xe6   :  { %v279_v40 = vpop.f32.mrb[2].mxu0 }
  0xe7   :  { %v280_v41 = vadd.f32 %v379_v38, %v279_v40  ;;  %v352_v42 = vpop.f32.mrb[2].mxu1  ;;  %v437_v43 = vpop.f32.mrb[3].mxu0 }
  0xe8   :  { %v353_v44 = vadd.f32 %v380_v39, %v352_v42  ;;  %v448_v45 = vpop.f32.mrb[3].mxu1 }
  0xe9   :  { %359 = vst.msk [vmem:[#allocation2 + $0x10] sm:$0xff] %vm356_vm2, %v280_v41 }
  0xea   :  { %360 = vst.msk [vmem:[#allocation2 + $0x18] sm:$0xff] %vm356_vm2, %v353_v44 }
  0xeb   :  { %490 = shalt.err (!%p487_p4)
}
  0xec   :  { %s491_s8 = scalar_lea.hbm %s628_s3, 512 }
  0xed   :  { %p492_p5 = scmp.ne.s32.totalorder %s628_s3, %s491_s8  ;;  %p495_p6 = scmp.lt.u32.totalorder %s491_s8, %s628_s3 }
  0xef   :  { %p497_p7 = pnand %p495_p6, %p492_p5 }
  0xf1   :  { %500 = shalt.err (!%p497_p7)
}
  0xf2   :  { %s507_s13 = smov 128   ;;  %s508_s14 = smov 8  }
  0xf3   :  { %372 = dma.vmem_to_hbm [thread:$0]  %s367_s30, 512, %s628_s3, [#allocation3], %s507_s13, %s507_s13, %s508_s14  }
  0xf4   :  { %501 = dma.done.wait [#allocation3], 512  }
  0xf5   :  { %502 = vsyncadd [#allocation3], 4294966784 }
  0xf6   :  { %376 = vsyncpa [#allocation3], 1 }

</bundles_post_ra>
